<compile_context>
chip_gen: v7x
topology: tpu7x:2x2x1
jax: 0.10.0
libtpu: 0.0.40
codegen_flags: <defaults>
</compile_context>

<pallas_src>
import jax
import jax.numpy as jnp
from jax.experimental import pallas as pl
from jax.experimental.pallas import tpu as pltpu


def mappo_actor_kernel(x_ref, w1_ref, b1_ref, w2_ref, b2_ref,
                       wmu_ref, bmu_ref, mu_ref):
    x = x_ref[...]                                                    # (TB, obs_dim) f32
    # hidden layer 1: Linear + ReLU
    h1 = jnp.dot(x, w1_ref[...], preferred_element_type=jnp.float32) + b1_ref[...]
    h1 = jnp.maximum(h1, 0.0)
    # hidden layer 2: Linear + ReLU
    h2 = jnp.dot(h1, w2_ref[...], preferred_element_type=jnp.float32) + b2_ref[...]
    h2 = jnp.maximum(h2, 0.0)
    # mu head: Linear + tanh
    mu = jnp.tanh(jnp.dot(h2, wmu_ref[...], preferred_element_type=jnp.float32)
                  + bmu_ref[...])
    mu_ref[...] = mu.astype(mu_ref.dtype)


def mappo_actor_forward(x, params, *, block_b=1024):
    """x: (B, obs_dim) f32. Returns (mu, std), each (B, act_dim) f32.

    block_b: batch tile per grid step. 1024 keeps per-tile activations (~1 MB each
    hidden layer) comfortably inside VMEM on v5e/v6e (128 MiB) and v7x (64 MiB, 32 MiB
    default scoped) with double-buffered x/mu tiles; per-step overhead (~0.35 us) is
    well amortized at this size.
    """
    w1, b1, w2, b2, wmu, bmu, log_std = params
    B, obs_dim = x.shape
    hidden = w1.shape[1]
    act_dim = wmu.shape[1]

    # Batch tile: multiple of 8 sublanes, at most block_b; pad B up to a multiple of it.
    b_pad8 = ((B + 7) // 8) * 8
    tb = min(block_b, b_pad8)
    bp = ((B + tb - 1) // tb) * tb
    x_p = jnp.pad(x, ((0, bp - B), (0, 0))) if bp != B else x

    grid = (bp // tb,)

    x_spec = pl.BlockSpec((tb, obs_dim), lambda i: (i, 0))

    def resident(arr):
        # Full-array block, same block index every grid step -> stays in VMEM.
        return pl.BlockSpec(arr.shape, lambda i: (0, 0))

    cost = pl.CostEstimate(
        flops=2 * bp * (obs_dim * hidden + hidden * hidden + hidden * act_dim),
        transcendentals=bp * act_dim,
        bytes_accessed=4 * (x_p.size + w1.size + b1.size + w2.size + b2.size
                            + wmu.size + bmu.size + bp * act_dim),
    )

    mu = pl.pallas_call(
        mappo_actor_kernel,
        out_shape=jax.ShapeDtypeStruct((bp, act_dim), jnp.float32),
        grid=grid,
        in_specs=[x_spec,
                  resident(w1), resident(b1),
                  resident(w2), resident(b2),
                  resident(wmu), resident(bmu)],
        out_specs=pl.BlockSpec((tb, act_dim), lambda i: (i, 0)),
        compiler_params=pltpu.CompilerParams(
            dimension_semantics=("parallel",)),
        cost_estimate=cost,
    )(x_p, w1, b1, w2, b2, wmu, bmu)

    mu = mu[:B]
    # std is batch-independent: compute outside the kernel and broadcast (no HBM
    # writeback of a second masked-lane output per call).
    std = jnp.broadcast_to(jnp.exp(log_std), mu.shape)
    return mu, std


def init_params(key, obs_dim, act_dim, hidden_size=256):
    """Deterministic init mirroring PyTorch nn.Linear default (U[-1/sqrt(fan_in), +])."""
    ks = jax.random.split(key, 6)

    def linear(kw, kb, fan_in, fan_out):
        bound = 1.0 / jnp.sqrt(fan_in)
        w = jax.random.uniform(kw, (fan_in, fan_out), jnp.float32, -bound, bound)
        b = jax.random.uniform(kb, (1, fan_out), jnp.float32, -bound, bound)
        return w, b

    w1, b1 = linear(ks[0], ks[1], obs_dim, hidden_size)
    w2, b2 = linear(ks[2], ks[3], hidden_size, hidden_size)
    wmu, bmu = linear(ks[4], ks[5], hidden_size, act_dim)
    log_std = jnp.zeros((1, act_dim), jnp.float32)   # nn.Parameter(torch.zeros(act_dim))
    return (w1, b1, w2, b2, wmu, bmu, log_std)


def reference_forward(x, params):
    w1, b1, w2, b2, wmu, bmu, log_std = params
    h = jnp.maximum(x @ w1 + b1, 0.0)
    h = jnp.maximum(h @ w2 + b2, 0.0)
    mu = jnp.tanh(h @ wmu + bmu)
    std = jnp.broadcast_to(jnp.exp(log_std), mu.shape)
    return mu, std


if __name__ == "__main__":
    obs_dim, act_dim, hidden_size = 24, 2, 256   # Tennis env: obs=24, act=2

    key = jax.random.PRNGKey(0)
    kx, kp = jax.random.split(key)
    params = init_params(kp, obs_dim, act_dim, hidden_size)

    # (batch, block_b): single-tile, padded-batch, and multi-tile grid cases.
    for batch, block_b in ((8, 1024), (100, 64), (2048, 1024)):
        x = jax.random.normal(jax.random.fold_in(kx, batch),
                              (batch, obs_dim), jnp.float32)
        mu, std = jax.block_until_ready(
            mappo_actor_forward(x, params, block_b=block_b))

        mu_ref, std_ref = reference_forward(x, params)
        assert mu.shape == (batch, act_dim) and std.shape == (batch, act_dim)
        assert jnp.allclose(mu, mu_ref, atol=1e-5, rtol=1e-5)
        assert jnp.allclose(std, std_ref, atol=1e-6, rtol=1e-6)

    print("KERNEL_OK")
</pallas_src>

<mosaic_0001>
module attributes {stable_mosaic.version = 11 : i64} {
  func.func @mappo_actor_kernel(%arg0: i32, %arg1: memref<8x24xf32, #tpu.memory_space<vmem>>, %arg2: memref<24x256xf32, #tpu.memory_space<vmem>>, %arg3: memref<1x256xf32, #tpu.memory_space<vmem>>, %arg4: memref<256x256xf32, #tpu.memory_space<vmem>>, %arg5: memref<1x256xf32, #tpu.memory_space<vmem>>, %arg6: memref<256x2xf32, #tpu.memory_space<vmem>>, %arg7: memref<1x2xf32, #tpu.memory_space<vmem>>, %arg8: memref<8x2xf32, #tpu.memory_space<vmem>>) attributes {dimension_semantics = [#tpu.dimension_semantics<parallel>], iteration_bounds = array<i64: 1>, scalar_prefetch = 0 : i64, scratch_operands = 0 : i64, tpu.core_type = #tpu.core_type<tc>, window_params = [{transform_indices = @transform_0, window_bounds = array<i64: 8, 24>}, {pipeline_mode = #tpu.pipeline_mode<synchronous>, transform_indices = @transform_1, window_bounds = array<i64: 24, 256>}, {pipeline_mode = #tpu.pipeline_mode<synchronous>, transform_indices = @transform_2, window_bounds = array<i64: 1, 256>}, {pipeline_mode = #tpu.pipeline_mode<synchronous>, transform_indices = @transform_3, window_bounds = array<i64: 256, 256>}, {pipeline_mode = #tpu.pipeline_mode<synchronous>, transform_indices = @transform_4, window_bounds = array<i64: 1, 256>}, {pipeline_mode = #tpu.pipeline_mode<synchronous>, transform_indices = @transform_5, window_bounds = array<i64: 256, 2>}, {pipeline_mode = #tpu.pipeline_mode<synchronous>, transform_indices = @transform_6, window_bounds = array<i64: 1, 2>}, {transform_indices = @transform_7, window_bounds = array<i64: 8, 2>}]} {
    %c0 = arith.constant 0 : index
    %c0_0 = arith.constant 0 : index
    %0 = vector.load %arg1[%c0, %c0_0] : memref<8x24xf32, #tpu.memory_space<vmem>>, vector<8x24xf32>
    %c0_1 = arith.constant 0 : index
    %c0_2 = arith.constant 0 : index
    %1 = vector.load %arg2[%c0_1, %c0_2] : memref<24x256xf32, #tpu.memory_space<vmem>>, vector<24x256xf32>
    %cst = arith.constant dense<0.000000e+00> : vector<8x256xf32>
    %2 = tpu.matmul %0, %1, %cst {dimension_numbers = #tpu.dot_dimension_numbers<[1], [0], [0], [1], [0, 0, 1, 1], [], []>} : vector<8x24xf32>, vector<24x256xf32>, vector<8x256xf32> -> vector<8x256xf32>
    %c0_3 = arith.constant 0 : index
    %c0_4 = arith.constant 0 : index
    %3 = vector.load %arg3[%c0_3, %c0_4] : memref<1x256xf32, #tpu.memory_space<vmem>>, vector<1x256xf32>
    %4 = vector.broadcast %3 : vector<1x256xf32> to vector<8x256xf32>
    %5 = arith.addf %2, %4 : vector<8x256xf32>
    %cst_5 = arith.constant 0.000000e+00 : f32
    %6 = vector.broadcast %cst_5 : f32 to vector<8x256xf32>
    %7 = arith.maximumf %5, %6 : vector<8x256xf32>
    %c0_6 = arith.constant 0 : index
    %c0_7 = arith.constant 0 : index
    %8 = vector.load %arg4[%c0_6, %c0_7] : memref<256x256xf32, #tpu.memory_space<vmem>>, vector<256x256xf32>
    %cst_8 = arith.constant dense<0.000000e+00> : vector<8x256xf32>
    %9 = tpu.matmul %7, %8, %cst_8 {dimension_numbers = #tpu.dot_dimension_numbers<[1], [0], [0], [1], [0, 0, 1, 1], [], []>} : vector<8x256xf32>, vector<256x256xf32>, vector<8x256xf32> -> vector<8x256xf32>
    %c0_9 = arith.constant 0 : index
    %c0_10 = arith.constant 0 : index
    %10 = vector.load %arg5[%c0_9, %c0_10] : memref<1x256xf32, #tpu.memory_space<vmem>>, vector<1x256xf32>
    %11 = vector.broadcast %10 : vector<1x256xf32> to vector<8x256xf32>
    %12 = arith.addf %9, %11 : vector<8x256xf32>
    %cst_11 = arith.constant 0.000000e+00 : f32
    %13 = vector.broadcast %cst_11 : f32 to vector<8x256xf32>
    %14 = arith.maximumf %12, %13 : vector<8x256xf32>
    %c0_12 = arith.constant 0 : index
    %c0_13 = arith.constant 0 : index
    %15 = vector.load %arg6[%c0_12, %c0_13] : memref<256x2xf32, #tpu.memory_space<vmem>>, vector<256x2xf32>
    %cst_14 = arith.constant dense<0.000000e+00> : vector<8x2xf32>
    %16 = tpu.matmul %14, %15, %cst_14 {dimension_numbers = #tpu.dot_dimension_numbers<[1], [0], [0], [1], [0, 0, 1, 1], [], []>} : vector<8x256xf32>, vector<256x2xf32>, vector<8x2xf32> -> vector<8x2xf32>
    %c0_15 = arith.constant 0 : index
    %c0_16 = arith.constant 0 : index
    %17 = vector.load %arg7[%c0_15, %c0_16] : memref<1x2xf32, #tpu.memory_space<vmem>>, vector<1x2xf32>
    %18 = vector.broadcast %17 : vector<1x2xf32> to vector<8x2xf32>
    %19 = arith.addf %16, %18 : vector<8x2xf32>
    %20 = math.tanh %19 : vector<8x2xf32>
    %c0_17 = arith.constant 0 : index
    %c0_18 = arith.constant 0 : index
    %21 = vector.load %arg8[%c0_17, %c0_18] : memref<8x2xf32, #tpu.memory_space<vmem>>, vector<8x2xf32>
    tpu.vector_store %arg8[%c0_17, %c0_18], %20 {strides = array<i32>} : memref<8x2xf32, #tpu.memory_space<vmem>>, vector<8x2xf32>,
    return
  }
  func.func @transform_0(%arg0: i32) -> (i32, i32) {
    %c0_i32 = arith.constant 0 : i32
    %c0_i32_0 = arith.constant 0 : i32
    return %arg0, %c0_i32 : i32, i32
  }
  func.func @transform_1(%arg0: i32) -> (i32, i32) {
    %c0_i32 = arith.constant 0 : i32
    %c0_i32_0 = arith.constant 0 : i32
    %c0_i32_1 = arith.constant 0 : i32
    return %c0_i32, %c0_i32_0 : i32, i32
  }
  func.func @transform_2(%arg0: i32) -> (i32, i32) {
    %c0_i32 = arith.constant 0 : i32
    %c0_i32_0 = arith.constant 0 : i32
    %c0_i32_1 = arith.constant 0 : i32
    return %c0_i32, %c0_i32_0 : i32, i32
  }
  func.func @transform_3(%arg0: i32) -> (i32, i32) {
    %c0_i32 = arith.constant 0 : i32
    %c0_i32_0 = arith.constant 0 : i32
    %c0_i32_1 = arith.constant 0 : i32
    return %c0_i32, %c0_i32_0 : i32, i32
  }
  func.func @transform_4(%arg0: i32) -> (i32, i32) {
    %c0_i32 = arith.constant 0 : i32
    %c0_i32_0 = arith.constant 0 : i32
    %c0_i32_1 = arith.constant 0 : i32
    return %c0_i32, %c0_i32_0 : i32, i32
  }
  func.func @transform_5(%arg0: i32) -> (i32, i32) {
    %c0_i32 = arith.constant 0 : i32
    %c0_i32_0 = arith.constant 0 : i32
    %c0_i32_1 = arith.constant 0 : i32
    return %c0_i32, %c0_i32_0 : i32, i32
  }
  func.func @transform_6(%arg0: i32) -> (i32, i32) {
    %c0_i32 = arith.constant 0 : i32
    %c0_i32_0 = arith.constant 0 : i32
    %c0_i32_1 = arith.constant 0 : i32
    return %c0_i32, %c0_i32_0 : i32, i32
  }
  func.func @transform_7(%arg0: i32) -> (i32, i32) {
    %c0_i32 = arith.constant 0 : i32
    %c0_i32_0 = arith.constant 0 : i32
    return %arg0, %c0_i32 : i32, i32
  }
}

</mosaic_0001>

<bundles_post_ra>
// kernel: tpu_custom_call.1
= control target key start
LH: loop header
LB: loop body
LE: loop exit
PB: predicated region body
PF: predicated region fallthrough
CT: control target
= control target key end

     0   :  { %12 = vsyncpa [#allocation3], 0  ;;  %s569_s24 = smov [#allocation2]   ;;  %s754_s0 = inlined_call_operand.vmem [shape: f32[8,24], index: 0, kind: input, shape index: {}]   ;;  %s755_s1 = inlined_call_operand.vmem [shape: f32[24,256], index: 1, kind: input, shape index: {}]   ;;  %s756_s2 = inlined_call_operand.vmem [shape: f32[1,256], index: 2, kind: input, shape index: {}]   ;;  %s757_s3 = inlined_call_operand.hbm [shape: f32[256,256], index: 3, kind: input, shape index: {}]   ;;  %s758_s4 = inlined_call_operand.vmem [shape: f32[1,256], index: 4, kind: input, shape index: {}]   ;;  %s759_s5 = inlined_call_operand.vmem [shape: f32[256,2], index: 5, kind: input, shape index: {}]   ;;  %s760_s6 = inlined_call_operand.vmem [shape: f32[1,2], index: 6, kind: input, shape index: {}]   ;;  %s761_s7 = inlined_call_operand.vmem [shape: f32[8,2], index: 7, kind: output, shape index: {}]  }
   0x1   :  { %s24_s25 = sshll.u32 %s569_s24, 4  ;;  %s545_s28 = scalar_lea.hbm %s757_s3, 8192  ;;  %s25_s25 = int_to_ptr.vmem [resolvable:$true] %s24_s25 }
   0x2   :  { %p546_p0 = scmp.ne.s32.totalorder %s757_s3, %s545_s28  ;;  %p549_p1 = scmp.lt.u32.totalorder %s545_s28, %s757_s3 }
   0x4   :  { %p551_p2 = pnand %p549_p1, %p546_p0 }
   0x6   :  { %554 = shalt.err (!%p551_p2)
}
   0x7   :  { %s555_s10 = scalar_lea.vmem %s25_s25, 8192  ;;  %p560_p4 = scmp.lt.s32.totalorder %s25_s25, %s25_s25 }
   0x8   :  { %p556_p3 = scmp.ne.s32.totalorder %s25_s25, %s555_s10  ;;  %p561_p5 = scmp.lt.s32.totalorder %s555_s10, %s555_s10 }
   0xa   :  { %p562_p6 = por %p561_p5, %p560_p4 }
   0xc   :  { %p563_p7 = pnand %p562_p6, %p556_p3 }
   0xe   :  { %566 = shalt.err (!%p563_p7)
}
   0xf   :  { %s570_s11 = smov 256   ;;  %s571_s12 = smov 16  }
  0x10   :  { %30 = dma.hbm_to_vmem [thread:$0]  %s757_s3, 8192, %s25_s25, [#allocation3], %s570_s11, %s570_s11, %s571_s12  }
  0x11   :  { %567 = dma.done.wait [#allocation3], 8192  }
  0x12   :  { %568 = vsyncadd [#allocation3], 4294959104  ;;  %v572_v0 = vmov 0.0   ;;  %v42_v1 = vld [vmem:[%s755_s1 + $0x8] sm:$0xff]  ;;  %v44_v2 = vld [vmem:[%s755_s1 + $0x18] sm:$0xff]  ;;  %vm59_vm0 = vcmask 195584  }
  0x13   :  { %127 = vmatprep.mubr.f32.mxu0 %v572_v0  ;;  %v41_v3 = vld [vmem:[%s755_s1] sm:$0xff]  ;;  %v439_v4 = vpack.c.bf16 %v44_v2, %v42_v1  ;;  %v43_v5 = vld [vmem:[%s755_s1 + $0x10] sm:$0xff]  ;;  %v46_v7 = vld [vmem:[%s755_s1 + $0x28] sm:$0xff]  ;;  %vm395_vm1 = vcmask 15360  }
  0x14   :  { %v441_v6 = vpack.c.bf16 %v43_v5, %v41_v3  ;;  %v137_v8 = vld [vmem:[#allocation2 + $0x8] sm:$0xff]  ;;  %v139_v9 = vld [vmem:[#allocation2 + $0x18] sm:$0xff]  ;;  %v136_v11 = vld [vmem:[#allocation2] sm:$0xff] }
  0x15   :  { %440 = vmatprep.subr.bf16.mxu0 %v439_v4  ;;  %v443_v10 = vpack.c.bf16 %v139_v9, %v137_v8  ;;  %v138_v12 = vld [vmem:[#allocation2 + $0x10] sm:$0xff]  ;;  %v141_v13 = vld [vmem:[#allocation2 + $0x28] sm:$0xff]  ;;  %v143_v15 = vld [vmem:[#allocation2 + $0x38] sm:$0xff] }
  0x16   :  { %442 = vmatpush1.bf16.msra.mxu0 %v441_v6  ;;  %v445_v14 = vpack.c.bf16 %v138_v12, %v136_v11  ;;  %v140_v16 = vld [vmem:[#allocation2 + $0x20] sm:$0xff]  ;;  %v142_v17 = vld [vmem:[#allocation2 + $0x30] sm:$0xff]  ;;  %v447_v19 = vpack.c.bf16 %v143_v15, %v141_v13  ;;  %v145_v20 = vld [vmem:[#allocation2 + $0x48] sm:$0xff] }
  0x17   :  { %67 = vmatprep.subr.mxu0 %v46_v7  ;;  %v45_v18 = vld [vmem:[%s755_s1 + $0x20] sm:$0xff]  ;;  %444 = vmatprep.subr.bf16.mxu1 %v443_v10  ;;  %v147_v21 = vld [vmem:[#allocation2 + $0x58] sm:$0xff]  ;;  %v449_v23 = vpack.c.bf16 %v142_v17, %v140_v16  ;;  %v146_v26 = vld [vmem:[#allocation2 + $0x50] sm:$0xff] }
  0x18   :  { %v40_v22 = vld [vmem:[%s754_s0] sm:$0xff]  ;;  %446 = vmatpush1.bf16.msra.mxu1 %v445_v14  ;;  %v451_v24 = vpack.c.bf16 %v147_v21, %v145_v20  ;;  %v149_v27 = vld [vmem:[#allocation2 + $0x68] sm:$0xff]  ;;  %v151_v28 = vld [vmem:[#allocation2 + $0x78] sm:$0xff] }
  0x19   :  { %448 = vmatprep.subr.bf16.mxu1 %v447_v19  ;;  %v144_v25 = vld [vmem:[#allocation2 + $0x40] sm:$0xff]  ;;  %v455_v30 = vpack.c.bf16 %v151_v28, %v149_v27  ;;  %v150_v32 = vld [vmem:[#allocation2 + $0x70] sm:$0xff]  ;;  %v153_v33 = vld [vmem:[#allocation2 + $0x88] sm:$0xff] }
  0x1a   :  { %68 = vmatpush1.msra.mxu0 %v45_v18  ;;  %v453_v29 = vpack.c.bf16 %v146_v26, %v144_v25  ;;  %v148_v31 = vld [vmem:[#allocation2 + $0x60] sm:$0xff]  ;;  %v155_v34 = vld [vmem:[#allocation2 + $0x98] sm:$0xff]  ;;  %v154_v38 = vld [vmem:[#allocation2 + $0x90] sm:$0xff] }
  0x1b   :  { %402 = vmatmul.mubr.msk.f32.vlgmr.msra.gmra.mrb[0].mxu0 %vm59_vm0, %v40_v22  ;;  %v457_v35 = vpack.c.bf16 %v150_v32, %v148_v31  ;;  %v459_v36 = vpack.c.bf16 %v155_v34, %v153_v33  ;;  %v152_v37 = vld [vmem:[#allocation2 + $0x80] sm:$0xff]  ;;  %v157_v39 = vld [vmem:[#allocation2 + $0xa8] sm:$0xff]  ;;  %v159_v40 = vld [vmem:[#allocation2 + $0xb8] sm:$0xff] }
  0x1c   :  { %450 = vmatpush1.bf16.msra.mxu1 %v449_v23  ;;  %v461_v41 = vpack.c.bf16 %v154_v38, %v152_v37  ;;  %v463_v42 = vpack.c.bf16 %v159_v40, %v157_v39  ;;  %v156_v43 = vld [vmem:[#allocation2 + $0xa0] sm:$0xff]  ;;  %v158_v44 = vld [vmem:[#allocation2 + $0xb0] sm:$0xff]  ;;  %v161_v45 = vld [vmem:[#allocation2 + $0xc8] sm:$0xff] }
  0x1d   :  { %452 = vmatprep.subr.bf16.mxu1 %v451_v24  ;;  %v163_v46 = vld [vmem:[#allocation2 + $0xd8] sm:$0xff]  ;;  %v465_v47 = vpack.c.bf16 %v158_v44, %v156_v43  ;;  %v160_v49 = vld [vmem:[#allocation2 + $0xc0] sm:$0xff]  ;;  %v162_v50 = vld [vmem:[#allocation2 + $0xd0] sm:$0xff] }
  0x1e   :  { %v467_v48 = vpack.c.bf16 %v163_v46, %v161_v45  ;;  %v165_v51 = vld [vmem:[#allocation2 + $0xe8] sm:$0xff]  ;;  %v167_v52 = vld [vmem:[#allocation2 + $0xf8] sm:$0xff]  ;;  %v469_v53 = vpack.c.bf16 %v162_v50, %v160_v49  ;;  %v164_v55 = vld [vmem:[#allocation2 + $0xe0] sm:$0xff] }
  0x1f   :  { %v471_v54 = vpack.c.bf16 %v167_v52, %v165_v51  ;;  %v166_v56 = vld [vmem:[#allocation2 + $0xf0] sm:$0xff]  ;;  %v169_v57 = vld [vmem:[#allocation2 + $0x108] sm:$0xff]  ;;  %v171_v58 = vld [vmem:[#allocation2 + $0x118] sm:$0xff] }
  0x20   :  { %454 = vmatpush1.bf16.msra.mxu1 %v453_v29  ;;  %v473_v59 = vpack.c.bf16 %v166_v56, %v164_v55  ;;  %v475_v60 = vpack.c.bf16 %v171_v58, %v169_v57  ;;  %v168_v61 = vld [vmem:[#allocation2 + $0x100] sm:$0xff]  ;;  %v170_v62 = vld [vmem:[#allocation2 + $0x110] sm:$0xff]  ;;  %v173_v63 = vld [vmem:[#allocation2 + $0x128] sm:$0xff] }
  0x21   :  { %456 = vmatprep.subr.bf16.mxu1 %v455_v30  ;;  %v175_v0 = vld [vmem:[#allocation2 + $0x138] sm:$0xff]  ;;  %v477_v1 = vpack.c.bf16 %v170_v62, %v168_v61  ;;  %v172_v3 = vld [vmem:[#allocation2 + $0x120] sm:$0xff]  ;;  %v174_v4 = vld [vmem:[#allocation2 + $0x130] sm:$0xff] }
  0x22   :  { %v479_v2 = vpack.c.bf16 %v175_v0, %v173_v63  ;;  %v177_v5 = vld [vmem:[#allocation2 + $0x148] sm:$0xff]  ;;  %v179_v6 = vld [vmem:[#allocation2 + $0x158] sm:$0xff]  ;;  %v481_v7 = vpack.c.bf16 %v174_v4, %v172_v3  ;;  %v176_v9 = vld [vmem:[#allocation2 + $0x140] sm:$0xff] }
  0x23   :  { %v483_v8 = vpack.c.bf16 %v179_v6, %v177_v5  ;;  %v178_v10 = vld [vmem:[#allocation2 + $0x150] sm:$0xff]  ;;  %v181_v11 = vld [vmem:[#allocation2 + $0x168] sm:$0xff]  ;;  %v183_v12 = vld [vmem:[#allocation2 + $0x178] sm:$0xff] }
  0x24   :  { %458 = vmatpush1.bf16.msra.mxu1 %v457_v35  ;;  %v485_v13 = vpack.c.bf16 %v178_v10, %v176_v9  ;;  %v487_v14 = vpack.c.bf16 %v183_v12, %v181_v11  ;;  %v180_v15 = vld [vmem:[#allocation2 + $0x160] sm:$0xff]  ;;  %v182_v16 = vld [vmem:[#allocation2 + $0x170] sm:$0xff]  ;;  %v185_v17 = vld [vmem:[#allocation2 + $0x188] sm:$0xff] }
  0x25   :  { %460 = vmatprep.subr.bf16.mxu1 %v459_v36  ;;  %v187_v18 = vld [vmem:[#allocation2 + $0x198] sm:$0xff]  ;;  %v489_v19 = vpack.c.bf16 %v182_v16, %v180_v15  ;;  %v184_v21 = vld [vmem:[#allocation2 + $0x180] sm:$0xff]  ;;  %v186_v22 = vld [vmem:[#allocation2 + $0x190] sm:$0xff] }
  0x26   :  { %v491_v20 = vpack.c.bf16 %v187_v18, %v185_v17  ;;  %v189_v23 = vld [vmem:[#allocation2 + $0x1a8] sm:$0xff]  ;;  %v191_v24 = vld [vmem:[#allocation2 + $0x1b8] sm:$0xff]  ;;  %v493_v25 = vpack.c.bf16 %v186_v22, %v184_v21  ;;  %v188_v27 = vld [vmem:[#allocation2 + $0x1a0] sm:$0xff]  ;;  %v49_v17 = vlaneseq }
  0x27   :  { %v495_v26 = vpack.c.bf16 %v191_v24, %v189_v23  ;;  %v190_v28 = vld [vmem:[#allocation2 + $0x1b0] sm:$0xff]  ;;  %v193_v29 = vld [vmem:[#allocation2 + $0x1c8] sm:$0xff]  ;;  %v195_v30 = vld [vmem:[#allocation2 + $0x1d8] sm:$0xff] }
  0x28   :  { %462 = vmatpush1.bf16.msra.mxu1 %v461_v41  ;;  %v497_v31 = vpack.c.bf16 %v190_v28, %v188_v27  ;;  %v499_v32 = vpack.c.bf16 %v195_v30, %v193_v29  ;;  %v192_v33 = vld [vmem:[#allocation2 + $0x1c0] sm:$0xff]  ;;  %v194_v34 = vld [vmem:[#allocation2 + $0x1d0] sm:$0xff]  ;;  %v197_v36 = vld [vmem:[#allocation2 + $0x1e8] sm:$0xff]  ;;  %v50_v18 = vshrl.u32 %v49_v17, 7 }
  0x29   :  { %464 = vmatprep.subr.bf16.mxu1 %v463_v42  ;;  %v501_v35 = vpack.c.bf16 %v194_v34, %v192_v33  ;;  %v199_v37 = vld [vmem:[#allocation2 + $0x1f8] sm:$0xff]  ;;  %v196_v39 = vld [vmem:[#allocation2 + $0x1e0] sm:$0xff]  ;;  %v198_v40 = vld [vmem:[#allocation2 + $0x1f0] sm:$0xff] }
  0x2a   :  { %v503_v38 = vpack.c.bf16 %v199_v37, %v197_v36  ;;  %v505_v41 = vpack.c.bf16 %v198_v40, %v196_v39  ;;  %v301_v42 = vld [vmem:[%s759_s5 + $0x80] sm:$0xff]  ;;  %v302_v43 = vld [vmem:[%s759_s5 + $0x88] sm:$0xff]  ;;  %v287_v51 = vld [vmem:[%s759_s5 + $0x10] sm:$0xff]  ;;  %v55_v21 = vsub.s32 1, %v50_v18 }
  0x2b   :  { %v285_v44 = vld [vmem:[%s759_s5] sm:$0xff]  ;;  %v507_v45 = vpack.c.bf16 %v302_v43, %v301_v42  ;;  %v286_v46 = vld [vmem:[%s759_s5 + $0x8] sm:$0xff]  ;;  %v288_v52 = vld [vmem:[%s759_s5 + $0x18] sm:$0xff] }
  0x2c   :  { %466 = vmatpush1.bf16.msra.mxu1 %v465_v47  ;;  %v303_v47 = vld [vmem:[%s759_s5 + $0x90] sm:$0xff]  ;;  %v509_v49 = vpack.c.bf16 %v286_v46, %v285_v44  ;;  %v513_v55 = vpack.c.bf16 %v288_v52, %v287_v51  ;;  %v289_v57 = vld [vmem:[%s759_s5 + $0x20] sm:$0xff]  ;;  %v290_v58 = vld [vmem:[%s759_s5 + $0x28] sm:$0xff] }
  0x2d   :  { %468 = vmatprep.subr.bf16.mxu1 %v467_v48  ;;  %v304_v48 = vld [vmem:[%s759_s5 + $0x98] sm:$0xff]  ;;  %508 = vmatprep.subr.bf16.mxu0 %v507_v45  ;;  %v517_v61 = vpack.c.bf16 %v290_v58, %v289_v57  ;;  %v291_v63 = vld [vmem:[%s759_s5 + $0x30] sm:$0xff]  ;;  %v293_v5 = vld [vmem:[%s759_s5 + $0x40] sm:$0xff] }
  0x2e   :  { %v511_v50 = vpack.c.bf16 %v304_v48, %v303_v47  ;;  %510 = vmatpush3.bf16.msra.mxu0 %v509_v49  ;;  %v292_v0 = vld [vmem:[%s759_s5 + $0x38] sm:$0xff]  ;;  %v294_v6 = vld [vmem:[%s759_s5 + $0x48] sm:$0xff]  ;;  %v295_v11 = vld [vmem:[%s759_s5 + $0x50] sm:$0xff] }
  0x2f   :  { %v521_v3 = vpack.c.bf16 %v292_v0, %v291_v63  ;;  %v525_v9 = vpack.c.bf16 %v294_v6, %v293_v5  ;;  %v296_v12 = vld [vmem:[%s759_s5 + $0x58] sm:$0xff]  ;;  %v297_v30 = vld [vmem:[%s759_s5 + $0x60] sm:$0xff]  ;;  %v315_v33 = vld [vmem:[%s759_s5 + $0xf0] sm:$0xff] }
  0x30   :  { %470 = vmatpush1.bf16.msra.mxu1 %v469_v53  ;;  %v305_v53 = vld [vmem:[%s759_s5 + $0xa0] sm:$0xff]  ;;  %512 = vmatprep.subr.bf16.mxu0 %v511_v50  ;;  %v529_v15 = vpack.c.bf16 %v296_v12, %v295_v11  ;;  %v316_v34 = vld [vmem:[%s759_s5 + $0xf8] sm:$0xff]  ;;  %v299_v36 = vld [vmem:[%s759_s5 + $0x70] sm:$0xff] }
  0x31   :  { %472 = vmatprep.subr.bf16.mxu1 %v471_v54  ;;  %v306_v54 = vld [vmem:[%s759_s5 + $0xa8] sm:$0xff]  ;;  %v300_v37 = vld [vmem:[%s759_s5 + $0x78] sm:$0xff]  ;;  %v200_v39 = vld [vmem:[%s758_s4] sm:$0x3] }
  0x32   :  { %v515_v56 = vpack.c.bf16 %v306_v54, %v305_v53  ;;  %514 = vmatpush3.bf16.msra.mxu0 %v513_v55  ;;  %v403_v49 = vld [vmem:[%s760_s6] ss:$0 sm:$0xff] }
  0x34   :  { %474 = vmatpush1.bf16.msra.mxu1 %v473_v59  ;;  %v307_v59 = vld [vmem:[%s759_s5 + $0xb0] sm:$0xff]  ;;  %516 = vmatprep.subr.bf16.mxu0 %v515_v56 }
  0x35   :  { %476 = vmatprep.subr.bf16.mxu1 %v475_v60  ;;  %v308_v60 = vld [vmem:[%s759_s5 + $0xb8] sm:$0xff] }
  0x36   :  { %v519_v62 = vpack.c.bf16 %v308_v60, %v307_v59  ;;  %518 = vmatpush3.bf16.msra.mxu0 %v517_v61 }
  0x38   :  { %478 = vmatpush1.bf16.msra.mxu1 %v477_v1  ;;  %v309_v1 = vld [vmem:[%s759_s5 + $0xc0] sm:$0xff]  ;;  %520 = vmatprep.subr.bf16.mxu0 %v519_v62 }
  0x39   :  { %480 = vmatprep.subr.bf16.mxu1 %v479_v2  ;;  %v310_v2 = vld [vmem:[%s759_s5 + $0xc8] sm:$0xff] }
  0x3a   :  { %v523_v4 = vpack.c.bf16 %v310_v2, %v309_v1  ;;  %522 = vmatpush3.bf16.msra.mxu0 %v521_v3 }
  0x3c   :  { %482 = vmatpush1.bf16.msra.mxu1 %v481_v7  ;;  %v311_v7 = vld [vmem:[%s759_s5 + $0xd0] sm:$0xff]  ;;  %524 = vmatprep.subr.bf16.mxu0 %v523_v4 }
  0x3d   :  { %484 = vmatprep.subr.bf16.mxu1 %v483_v8  ;;  %v312_v8 = vld [vmem:[%s759_s5 + $0xd8] sm:$0xff] }
  0x3e   :  { %v527_v10 = vpack.c.bf16 %v312_v8, %v311_v7  ;;  %526 = vmatpush3.bf16.msra.mxu0 %v525_v9 }
  0x40   :  { %486 = vmatpush1.bf16.msra.mxu1 %v485_v13  ;;  %v313_v13 = vld [vmem:[%s759_s5 + $0xe0] sm:$0xff]  ;;  %528 = vmatprep.subr.bf16.mxu0 %v527_v10 }
  0x41   :  { %488 = vmatprep.subr.bf16.mxu1 %v487_v14  ;;  %v314_v14 = vld [vmem:[%s759_s5 + $0xe8] sm:$0xff] }
  0x42   :  { %v531_v16 = vpack.c.bf16 %v314_v14, %v313_v13  ;;  %530 = vmatpush3.bf16.msra.mxu0 %v529_v15 }
  0x44   :  { %490 = vmatpush1.bf16.msra.mxu1 %v489_v19  ;;  %532 = vmatprep.subr.bf16.mxu0 %v531_v16  ;;  %v51_v19 = vsub.s32 0, %v50_v18 }
  0x45   :  { %492 = vmatprep.subr.bf16.mxu1 %v491_v20  ;;  %v47_v20 = vld [vmem:[%s756_s2] sm:$0x3] }
  0x46   :  { %v52_v22 = vrot.slane %v47_v20, %v51_v19  ;;  %v56_v23 = vrot.slane %v47_v20, %v55_v21  ;;  %v205_v40 = vrot.slane %v200_v39, %v51_v19 }
  0x48   :  { %494 = vmatpush1.bf16.msra.mxu1 %v493_v25 }
  0x49   :  { %496 = vmatprep.subr.bf16.mxu1 %v495_v26 }
  0x4c   :  { %498 = vmatpush1.bf16.msra.mxu1 %v497_v31  ;;  %v298_v31 = vld [vmem:[%s759_s5 + $0x68] sm:$0xff] }
  0x4d   :  { %500 = vmatprep.subr.bf16.mxu1 %v499_v32  ;;  %v533_v32 = vpack.c.bf16 %v298_v31, %v297_v30 }
  0x4f   :  { %534 = vmatpush3.bf16.msra.mxu0 %v533_v32 }
  0x50   :  { %502 = vmatpush1.bf16.msra.mxu1 %v501_v35  ;;  %v535_v35 = vpack.c.bf16 %v316_v34, %v315_v33 }
  0x51   :  { %504 = vmatprep.subr.bf16.mxu1 %v503_v38  ;;  %v537_v38 = vpack.c.bf16 %v300_v37, %v299_v36 }
  0x52   :  { %536 = vmatprep.subr.bf16.mxu0 %v535_v35 }
  0x53   :  { %538 = vmatpush3.bf16.msra.mxu0 %v537_v38 }
  0x54   :  { %506 = vmatpush1.bf16.msra.mxu1 %v505_v41  ;;  %v209_v41 = vrot.slane %v200_v39, %v55_v21 }
  0xee   :  { %v129_v24 = vpop.f32.mrb[0].mxu0 }
  0xef   :  { %v130_v25 = vadd.f32 %v129_v24, %v52_v22  ;;  %v131_v26 = vpop.f32.mrb[1].mxu0 }
  0xf0   :  { %v132_v27 = vadd.f32 %v131_v26, %v56_v23 }
  0xf1   :  { %v134_v29 = vmax.f32 %v130_v25, 0.0 }
  0xf2   :  { %v135_v28 = vmax.f32 %v132_v27, 0.0 }
  0xf4   :  { %276 = vmatprep.mubr.f32.mxu1 %v135_v28 }
  0xf5   :  { %277 = vmatmul.mubr.f32.vlgmr.msra.gmra.mrb[0].mxu1 %v134_v29 }
 0x1c8   :  { %v278_v42 = vpop.f32.mrb[0].mxu1 }
 0x1c9   :  { %v279_v43 = vadd.f32 %v278_v42, %v205_v40  ;;  %v280_v44 = vpop.f32.mrb[1].mxu1 }
 0x1ca   :  { %v281_v45 = vadd.f32 %v280_v44, %v209_v41 }
 0x1cb   :  { %v283_v47 = vmax.f32 %v279_v43, 0.0 }
 0x1cc   :  { %v284_v46 = vmax.f32 %v281_v45, 0.0 }
 0x1ce   :  { %388 = vmatprep.mubr.f32.mxu0 %v284_v46 }
 0x1cf   :  { %389 = vmatmul.mubr.f32.vlgmr.msra.gmra.mrb[2].mxu0 %v283_v47 }
 0x2a2   :  { %v436_v48 = vpop.f32.mrb[2].mxu0 }
 0x2a3   :  { %v437_v50 = vpop.f32.mrb[3].mxu0 }
 0x2a4   :  { %v438_v51 = vadd.f32 %v437_v50, %v436_v48 }
 0x2a6   :  { %v391_v52 = vadd.f32 %v438_v51, %v403_v49 }
 0x2a8   :  { %543 = vtanh.f32 %v391_v52 }
 0x2b2   :  { %v544_v53 = vpop.eup %543 }
 0x2b3   :  { %396 = vst.msk [vmem:[%s761_s7] sm:$0xff] %vm395_vm1, %v544_v53 }
 0x2b4   :  { %401 = vsyncpa [#allocation3], 1 }

</bundles_post_ra>
